<compile_context>
chip_gen: v6e
topology: v6e:2x2x1
jax: 0.10.0
libtpu: 0.0.40
codegen_flags: <defaults>
</compile_context>

<pallas_src>
import jax
import jax.numpy as jnp
from jax.experimental import pallas as pl
from jax.experimental.pallas import tpu as pltpu


# ~2 MiB blocks: big enough to sit near the HBM roofline on v5e/v6e/v7x, small
# enough that 2 arrays x 2 pipeline buffers (~8 MiB) fits every generation's
# default scoped VMEM budget.
_TARGET_BLOCK_BYTES = 2 * 1024 * 1024
_MAX_LANE_WIDTH = 8 * 1024  # keep width bounded so large arrays still get >=8 rows


def _identity_copy_kernel(mem_ref, out_ref):
    # Pure pass-through: out tile = memory tile.
    out_ref[...] = mem_ref[...]


def _lane_dense_width(n_elems):
    """Largest multiple-of-128 width (<= cap) that evenly divides n_elems; 0 if none."""
    best = 0
    w = 128
    while w <= min(n_elems, _MAX_LANE_WIDTH):
        if n_elems % w == 0:
            best = w
        w += 128
    return best


def dummy_decoder_forward(tgt, memory):
    """Pallas-level equivalent of DummyDecoder.forward: return `memory` untouched.

    The optimal implementation moves no data at all, so no kernel is launched.
    `tgt` is accepted for API parity and ignored, exactly like the PyTorch module.
    """
    del tgt  # unused, as in the reference module
    return memory


def dummy_decoder_forward_pallas_copy(tgt, memory):
    """Identity as an explicit Pallas copy kernel (fresh output buffer).

    Only needed when a distinct, materialized output is required; otherwise use
    `dummy_decoder_forward` (zero-copy).
    """
    del tgt  # unused, as in the reference module
    orig_shape = memory.shape
    n = memory.size

    width = _lane_dense_width(n)
    if width == 0:
        # Element count not a multiple of 128 (only plausible for tiny arrays):
        # single full-extent block — full-dim blocks are always layout-legal.
        rows, width = 1, n
    else:
        rows = n // width
    flat = memory.reshape(rows, width)

    bytes_per_row = width * flat.dtype.itemsize
    rows_per_block = max(1, _TARGET_BLOCK_BYTES // bytes_per_row)
    if rows_per_block >= rows:
        rows_per_block = rows  # full-extent block: always legal, grid collapses to (1,)
    else:
        # Keep the sublane dim a multiple of 8 (f32 tiling rule); Pallas masks the
        # ragged final block if rows isn't an exact multiple.
        rows_per_block = max(8, (rows_per_block // 8) * 8)

    grid = (pl.cdiv(rows, rows_per_block),)
    spec = pl.BlockSpec((rows_per_block, width), lambda i: (i, 0))

    out = pl.pallas_call(
        _identity_copy_kernel,
        out_shape=jax.ShapeDtypeStruct((rows, width), memory.dtype),
        grid=grid,
        in_specs=[spec],
        out_specs=spec,
        compiler_params=pltpu.CompilerParams(
            dimension_semantics=("parallel",),
        ),
    )(flat)
    return out.reshape(orig_shape)


if __name__ == "__main__":
    key = jax.random.PRNGKey(0)
    k_tgt, k_mem = jax.random.split(key)

    # Shapes implied by nn.TransformerDecoder convention: (seq, batch, hidden).
    seq, batch, hidden = 8, 2, 32
    tgt = jax.random.normal(k_tgt, (seq, batch, hidden), dtype=jnp.float32)
    memory = jax.random.normal(k_mem, (seq, batch, hidden), dtype=jnp.float32)

    # Fast path: exact module semantics, zero bytes moved.
    out_fast = dummy_decoder_forward(tgt, memory)
    out_fast = jax.block_until_ready(out_fast)

    # Pallas copy path: lane-dense flattened identity copy.
    out_copy = dummy_decoder_forward_pallas_copy(tgt, memory)
    out_copy = jax.block_until_ready(out_copy)

    # Verify exact forward semantics for both paths.
    assert out_fast.shape == memory.shape and out_fast.dtype == memory.dtype
    assert out_copy.shape == memory.shape and out_copy.dtype == memory.dtype
    assert bool(jnp.all(out_fast == memory))
    assert bool(jnp.all(out_copy == memory))

    print("KERNEL_OK")
</pallas_src>

<mosaic_0001>
module attributes {stable_mosaic.version = 11 : i64} {
  func.func @_identity_copy_kernel(%arg0: i32, %arg1: memref<1x512xf32, #tpu.memory_space<vmem>>, %arg2: memref<1x512xf32, #tpu.memory_space<vmem>>) attributes {dimension_semantics = [#tpu.dimension_semantics<parallel>], iteration_bounds = array<i64: 1>, scalar_prefetch = 0 : i64, scratch_operands = 0 : i64, tpu.core_type = #tpu.core_type<tc>, window_params = [{transform_indices = @transform_0, window_bounds = array<i64: 1, 512>}, {transform_indices = @transform_1, window_bounds = array<i64: 1, 512>}]} {
    %c0 = arith.constant 0 : index
    %c0_0 = arith.constant 0 : index
    %0 = vector.load %arg1[%c0, %c0_0] : memref<1x512xf32, #tpu.memory_space<vmem>>, vector<1x512xf32>
    %c0_1 = arith.constant 0 : index
    %c0_2 = arith.constant 0 : index
    %1 = vector.load %arg2[%c0_1, %c0_2] : memref<1x512xf32, #tpu.memory_space<vmem>>, vector<1x512xf32>
    tpu.vector_store %arg2[%c0_1, %c0_2], %0 {strides = array<i32>} : memref<1x512xf32, #tpu.memory_space<vmem>>, vector<1x512xf32>,
    return
  }
  func.func @transform_0(%arg0: i32) -> (i32, i32) {
    %c0_i32 = arith.constant 0 : i32
    %c0_i32_0 = arith.constant 0 : i32
    return %arg0, %c0_i32 : i32, i32
  }
  func.func @transform_1(%arg0: i32) -> (i32, i32) {
    %c0_i32 = arith.constant 0 : i32
    %c0_i32_0 = arith.constant 0 : i32
    return %arg0, %c0_i32 : i32, i32
  }
}

</mosaic_0001>

<bundles_post_ra>
// kernel: tpu_custom_call.1
= control target key start
LH: loop header
LB: loop body
LE: loop exit
PB: predicated region body
PF: predicated region fallthrough
CT: control target
= control target key end

     0   :  { %6 = vsyncpa [#allocation3], 0  ;;  %s106_s0 = inlined_call_operand.hbm [shape: f32[1,512], index: 0, kind: input, shape index: {}]   ;;  %s107_s1 = inlined_call_operand.hbm [shape: f32[1,512], index: 1, kind: output, shape index: {}]  }
   0x1   :  { %7 = vsyncpa [#allocation4], 0  ;;  %s88_s6 = smov [#allocation2]  }
   0x2   :  { %s14_s7 = sshll.u32 %s88_s6, 4  ;;  %s15_s7 = int_to_ptr.vmem [resolvable:$true] %s14_s7 }
   0x3   :  { %s52_s8 = scalar_lea.vmem %s15_s7, 64  ;;  %p57_p1 = scmp.lt.s32.totalorder %s15_s7, %s15_s7 }
   0x4   :  { %p53_p0 = scmp.ne.s32.totalorder %s15_s7, %s52_s8  ;;  %p58_p2 = scmp.lt.s32.totalorder %s52_s8, %s52_s8 }
   0x6   :  { %p59_p3 = por %p58_p2, %p57_p1 }
   0x8   :  { %p60_p4 = pnand %p59_p3, %p53_p0 }
   0xa   :  { %63 = shalt.err (!%p60_p4)
}
   0xb   :  { %17 = dma.hbm_to_vmem [thread:$0]  %s106_s0, 64, %s15_s7, [#allocation3]  }
   0xc   :  { %84 = dma.done.wait [#allocation3], 64  }
   0xd   :  { %85 = vsyncadd [#allocation3], 4294967232  ;;  %v22_v0 = vlaneseq  ;;  %s89_s11 = smov [#allocation5]   ;;  %v21_v1 = vld [vmem:[#allocation2] sm:$0xf] }
   0xe   :  { %s33_s12 = sshll.u32 %s89_s11, 4  ;;  %s34_s12 = int_to_ptr.vmem [resolvable:$true] %s33_s12 }
   0xf   :  { %vm24_vm0 = vcmp.lt.s32.totalorder %v22_v0, 512  ;;  %s64_s13 = scalar_lea.vmem %s34_s12, 64  ;;  %p69_p6 = scmp.lt.s32.totalorder %s34_s12, %s34_s12 }
  0x10   :  { %26 = vst.msk [vmem:[#allocation5] sm:$0xf] %vm24_vm0, %v21_v1  ;;  %p65_p5 = scmp.ne.s32.totalorder %s34_s12, %s64_s13  ;;  %p70_p7 = scmp.lt.s32.totalorder %s64_s13, %s64_s13 }
  0x12   :  { %p71_p8 = por %p70_p7, %p69_p6 }
  0x14   :  { %p72_p9 = pnand %p71_p8, %p65_p5 }
  0x16   :  { %75 = shalt.err (!%p72_p9)
}
  0x17   :  { %36 = dma.vmem_to_hbm [thread:$0]  %s34_s12, 64, %s107_s1, [#allocation4]  }
  0x18   :  { %86 = dma.done.wait [#allocation4], 64  }
  0x19   :  { %87 = vsyncadd [#allocation4], 4294967232 }
  0x1a   :  { %40 = vsyncpa [#allocation3], 1 }
  0x1b   :  { %41 = vsyncpa [#allocation4], 1 }

</bundles_post_ra>
